<compile_context>
chip_gen: v7x
topology: tpu7x:2x2x1
jax: 0.10.0
libtpu: 0.0.40
codegen_flags: <defaults>
</compile_context>

<pallas_src>
import math

import jax
import jax.numpy as jnp
from jax.experimental import pallas as pl
from jax.experimental.pallas import tpu as pltpu


def _round_up(x, m):
    return ((x + m - 1) // m) * m


def _sumsq_kernel(x_ref, out_ref, acc_ref):
    # x_ref:   (TN, TD) tile of the flattened latent (native dtype)
    # out_ref: (TN, 1)  per-row sum of squares (written at last D-block)
    # acc_ref: (TN, 1)  f32 VMEM accumulator, persistent across the D axis
    j = pl.program_id(1)

    @pl.when(j == 0)
    def _():
        acc_ref[...] = jnp.zeros_like(acc_ref)

    x = x_ref[...].astype(jnp.float32)
    acc_ref[...] += jnp.sum(x * x, axis=1, keepdims=True)

    @pl.when(j == pl.num_programs(1) - 1)
    def _():
        out_ref[...] = acc_ref[...]


def flow_unit_forward(x, logdet):
    """Forward pass of FlowUnit (reverse=False).

    Returns (z, logdet + latent_log_density(z)).
    """
    # TODO(synk): MultiStep is not defined in the provided source; the flow
    # step is treated as identity (z = x, step contributes 0 to logdet).
    N, C, H, W = x.shape
    D = C * H * W

    # Flatten; keep native dtype (cast happens inside the kernel).
    x2d = x.reshape(N, D)

    # Tile sizes: TN multiple of 8 (sublanes), TD multiple of 128 (lanes).
    # Sized conservatively for v7x (64 MiB physical / 32 MiB scoped VMEM):
    # 128*2048*4 B = 1 MiB per buffer, double-buffered = 2 MiB.
    TN = min(128, _round_up(N, 8))
    TD = min(2048, _round_up(D, 128))
    Npad = _round_up(N, TN)
    Dpad = _round_up(D, TD)

    if (Npad, Dpad) != (N, D):
        # Zero padding contributes 0 to the sum of squares -> exact result.
        x2d = jnp.pad(x2d, ((0, Npad - N), (0, Dpad - D)))

    grid = (Npad // TN, Dpad // TD)

    cost = pl.CostEstimate(
        flops=2 * Npad * Dpad,
        transcendentals=0,
        bytes_accessed=Npad * Dpad * x2d.dtype.itemsize + Npad * 4,
    )

    sumsq = pl.pallas_call(
        _sumsq_kernel,
        out_shape=jax.ShapeDtypeStruct((Npad, 1), jnp.float32),
        grid_spec=pltpu.PrefetchScalarGridSpec(
            num_scalar_prefetch=0,
            grid=grid,
            in_specs=[
                pl.BlockSpec((TN, TD), lambda i, j: (i, j)),
            ],
            out_specs=pl.BlockSpec((TN, 1), lambda i, j: (i, 0)),
            scratch_shapes=[pltpu.VMEM((TN, 1), jnp.float32)],
        ),
        compiler_params=pltpu.CompilerParams(
            dimension_semantics=("parallel", "arbitrary"),
        ),
        cost_estimate=cost,
    )(x2d)

    ss = sumsq[:N, 0]  # (N,)

    # Finalize: ld = sum(-0.5*log(2*pi) - 0.5*z**2) = D*const - 0.5*sum(z**2).
    const = jnp.float32(-0.5 * math.log(2.0 * math.pi))
    ld = jnp.float32(D) * const - 0.5 * ss

    z = x  # identity step (see TODO above)
    return z, logdet.astype(jnp.float32) + ld


def _reference_forward(x, logdet):
    """Pure-JAX reference mirroring the PyTorch semantics."""
    elt = -0.5 * jnp.log(2.0 * jnp.pi) - 0.5 * x.astype(jnp.float32) ** 2
    ld = jnp.sum(elt, axis=(1, 2, 3))
    return x, logdet + ld


if __name__ == "__main__":
    key = jax.random.PRNGKey(0)
    kx, kl = jax.random.split(key)

    # Small shapes consistent with FlowUnit(shape=(C, H, W)): N=2, C=4, H=W=16.
    N, C, H, W = 2, 4, 16, 16
    x = jax.random.normal(kx, (N, C, H, W), dtype=jnp.float32)
    logdet = jax.random.normal(kl, (N,), dtype=jnp.float32)

    z, out_logdet = flow_unit_forward(x, logdet)
    z = jax.block_until_ready(z)
    out_logdet = jax.block_until_ready(out_logdet)

    z_ref, out_ref = _reference_forward(x, logdet)
    assert z.shape == (N, C, H, W)
    assert out_logdet.shape == (N,)
    assert jnp.allclose(z, z_ref)
    assert jnp.allclose(out_logdet, out_ref, rtol=1e-5, atol=1e-4)

    print("KERNEL_OK")
</pallas_src>

<mosaic_0001>
module attributes {stable_mosaic.version = 11 : i64} {
  func.func @_sumsq_kernel(%arg0: i32, %arg1: i32, %arg2: memref<8x1024xf32, #tpu.memory_space<vmem>>, %arg3: memref<8x1xf32, #tpu.memory_space<vmem>>, %arg4: memref<8x1xf32, #tpu.memory_space<vmem>>) attributes {dimension_semantics = [#tpu.dimension_semantics<parallel>, #tpu.dimension_semantics<arbitrary>], iteration_bounds = array<i64: 1, 1>, scalar_prefetch = 0 : i64, scratch_operands = 1 : i64, tpu.core_type = #tpu.core_type<tc>, window_params = [{transform_indices = @transform_0, window_bounds = array<i64: 8, 1024>}, {transform_indices = @transform_1, window_bounds = array<i64: 8, 1>}]} {
    %c0_i32 = arith.constant 0 : i32
    %0 = arith.cmpi eq, %arg1, %c0_i32 : i32
    %1 = arith.extui %0 : i1 to i32
    %c0_i32_0 = arith.constant 0 : i32
    %2 = arith.cmpi ne, %1, %c0_i32_0 : i32
    scf.if %2 {
      %cst_8 = arith.constant 0.000000e+00 : f32
      %13 = vector.broadcast %cst_8 : f32 to vector<8x1xf32>
      %c0_9 = arith.constant 0 : index
      %c0_10 = arith.constant 0 : index
      %14 = vector.load %arg4[%c0_9, %c0_10] : memref<8x1xf32, #tpu.memory_space<vmem>>, vector<8x1xf32>
      tpu.vector_store %arg4[%c0_9, %c0_10], %13 {strides = array<i32>} : memref<8x1xf32, #tpu.memory_space<vmem>>, vector<8x1xf32>,
    } else {
    }
    %c0 = arith.constant 0 : index
    %c0_1 = arith.constant 0 : index
    %3 = vector.load %arg2[%c0, %c0_1] : memref<8x1024xf32, #tpu.memory_space<vmem>>, vector<8x1024xf32>
    %c0_2 = arith.constant 0 : index
    %c0_3 = arith.constant 0 : index
    %4 = vector.load %arg4[%c0_2, %c0_3] : memref<8x1xf32, #tpu.memory_space<vmem>>, vector<8x1xf32>
    %5 = arith.mulf %3, %3 : vector<8x1024xf32>
    %cst = arith.constant dense<0.000000e+00> : vector<8xf32>
    %6 = vector.multi_reduction <add>, %5, %cst [1] : vector<8x1024xf32> to vector<8xf32>
    %7 = vector.shape_cast %6 : vector<8xf32> to vector<8x1xf32>
    %8 = arith.addf %4, %7 : vector<8x1xf32>
    %c0_4 = arith.constant 0 : index
    %c0_5 = arith.constant 0 : index
    %9 = vector.load %arg4[%c0_4, %c0_5] : memref<8x1xf32, #tpu.memory_space<vmem>>, vector<8x1xf32>
    tpu.vector_store %arg4[%c0_4, %c0_5], %8 {strides = array<i32>} : memref<8x1xf32, #tpu.memory_space<vmem>>, vector<8x1xf32>,
    %c0_i32_6 = arith.constant 0 : i32
    %10 = arith.cmpi eq, %arg1, %c0_i32_6 : i32
    %11 = arith.extui %10 : i1 to i32
    %c0_i32_7 = arith.constant 0 : i32
    %12 = arith.cmpi ne, %11, %c0_i32_7 : i32
    scf.if %12 {
      %c0_8 = arith.constant 0 : index
      %c0_9 = arith.constant 0 : index
      %13 = vector.load %arg4[%c0_8, %c0_9] : memref<8x1xf32, #tpu.memory_space<vmem>>, vector<8x1xf32>
      %c0_10 = arith.constant 0 : index
      %c0_11 = arith.constant 0 : index
      %14 = vector.load %arg3[%c0_10, %c0_11] : memref<8x1xf32, #tpu.memory_space<vmem>>, vector<8x1xf32>
      tpu.vector_store %arg3[%c0_10, %c0_11], %13 {strides = array<i32>} : memref<8x1xf32, #tpu.memory_space<vmem>>, vector<8x1xf32>,
    } else {
    }
    return
  }
  func.func @transform_0(%arg0: i32, %arg1: i32) -> (i32, i32) {
    %c0_i32 = arith.constant 0 : i32
    return %arg0, %arg1 : i32, i32
  }
  func.func @transform_1(%arg0: i32, %arg1: i32) -> (i32, i32) {
    %c0_i32 = arith.constant 0 : i32
    %c0_i32_0 = arith.constant 0 : i32
    return %arg0, %c0_i32 : i32, i32
  }
}

</mosaic_0001>

<bundles_post_ra>
// kernel: tpu_custom_call.1
= control target key start
LH: loop header
LB: loop body
LE: loop exit
PB: predicated region body
PF: predicated region fallthrough
CT: control target
= control target key end

     0   :  { %6 = vsyncpa [#allocation4], 0  ;;  %s91_s6 = smov [#allocation3]   ;;  %s121_s0 = inlined_call_operand.hbm [shape: f32[8,1024], index: 0, kind: input, shape index: {}]   ;;  %s122_s1 = inlined_call_operand.vmem [shape: f32[8,1], index: 1, kind: output, shape index: {}]  }
   0x1   :  { %s13_s7 = sshll.u32 %s91_s6, 4  ;;  %s67_s10 = scalar_lea.hbm %s121_s0, 1024  ;;  %s14_s7 = int_to_ptr.vmem [resolvable:$true] %s13_s7 }
   0x2   :  { %p68_p0 = scmp.ne.s32.totalorder %s121_s0, %s67_s10  ;;  %p71_p1 = scmp.lt.u32.totalorder %s67_s10, %s121_s0 }
   0x4   :  { %p73_p2 = pnand %p71_p1, %p68_p0 }
   0x6   :  { %76 = shalt.err (!%p73_p2)
}
   0x7   :  { %s77_s15 = scalar_lea.vmem %s14_s7, 1024  ;;  %p82_p4 = scmp.lt.s32.totalorder %s14_s7, %s14_s7 }
   0x8   :  { %p78_p3 = scmp.ne.s32.totalorder %s14_s7, %s77_s15  ;;  %p83_p5 = scmp.lt.s32.totalorder %s77_s15, %s77_s15 }
   0xa   :  { %p84_p6 = por %p83_p5, %p82_p4 }
   0xc   :  { %p85_p7 = pnand %p84_p6, %p78_p3 }
   0xe   :  { %88 = shalt.err (!%p85_p7)
}
   0xf   :  { %16 = dma.hbm_to_vmem [thread:$0]  %s121_s0, 1024, %s14_s7, [#allocation4]  }
  0x10   :  { %89 = dma.done.wait [#allocation4], 1024  }
  0x11   :  { %90 = vsyncadd [#allocation4], 4294966272  ;;  %vm24_vm0 = vcmask 7168   ;;  %v92_v0 = vmov 0.0   ;;  %v26_v1 = vld [vmem:[#allocation3] sm:$0xff]  ;;  %v27_v2 = vld [vmem:[#allocation3 + $0x8] sm:$0xff] }
  0x12   :  { %25 = vst.msk [vmem:[#allocation2] sm:$0xff] %vm24_vm0, %v92_v0  ;;  %v28_v3 = vld [vmem:[#allocation3 + $0x10] sm:$0xff]  ;;  %v29_v4 = vld [vmem:[#allocation3 + $0x18] sm:$0xff]  ;;  %v35_v5 = vmul.f32 %v26_v1, %v26_v1  ;;  %v36_v6 = vmul.f32 %v27_v2, %v27_v2  ;;  %v30_v8 = vld [vmem:[#allocation3 + $0x20] sm:$0xff] }
  0x13   :  { %v37_v7 = vmul.f32 %v28_v3, %v28_v3  ;;  %v38_v9 = vmul.f32 %v29_v4, %v29_v4  ;;  %v31_v11 = vld [vmem:[#allocation3 + $0x28] sm:$0xff]  ;;  %v39_v12 = vmul.f32 %v30_v8, %v30_v8  ;;  %v32_v14 = vld [vmem:[#allocation3 + $0x30] sm:$0xff]  ;;  %v33_v17 = vld [vmem:[#allocation3 + $0x38] sm:$0xff] }
  0x14   :  { %v43_v10 = vadd.f32 %v36_v6, %v35_v5  ;;  %v40_v15 = vmul.f32 %v31_v11, %v31_v11  ;;  %v41_v18 = vmul.f32 %v32_v14, %v32_v14  ;;  %v42_v20 = vmul.f32 %v33_v17, %v33_v17 }
  0x16   :  { %v44_v13 = vadd.f32 %v43_v10, %v37_v7 }
  0x18   :  { %v45_v16 = vadd.f32 %v44_v13, %v38_v9 }
  0x19   :  { %v34_v24 = vld [vmem:[#allocation2] sm:$0xff] }
  0x1a   :  { %v46_v19 = vadd.f32 %v45_v16, %v39_v12 }
  0x1c   :  { %v47_v21 = vadd.f32 %v46_v19, %v40_v15 }
  0x1e   :  { %v48_v22 = vadd.f32 %v47_v21, %v41_v18 }
  0x20   :  { %v49_v23 = vadd.f32 %v48_v22, %v42_v20 }
  0x22   :  { %50 = vadd.xlane.f32.xlu0 %v49_v23 }
  0xaf   :  { %v51_v25 = vpop.xlane.xlu0 %50 }
  0xb0   :  { %v52_v26 = vadd.f32 %v51_v25, %v34_v24 }
  0xb2   :  { %54 = vst.msk [vmem:[#allocation2] sm:$0xff] %vm24_vm0, %v52_v26 }
  0xb9   :  { %v58_v27 = vld [vmem:[#allocation2] sm:$0xff] }
  0xba   :  { %59 = vst.msk [vmem:[%s122_s1] sm:$0xff] %vm24_vm0, %v58_v27 }
  0xbb   :  { %64 = vsyncpa [#allocation4], 1 }

</bundles_post_ra>
